<compile_context>
chip_gen: v7x
topology: tpu7x:2x2x1
jax: 0.10.0
libtpu: 0.0.40
codegen_flags: <defaults>
</compile_context>

<pallas_src>
import functools
from typing import NamedTuple

import jax
import jax.numpy as jnp
import numpy as np
from jax import lax
from jax.experimental import pallas as pl
from jax.experimental.pallas import tpu as pltpu

LN_EPS = 1e-5


def _round_up(x, m):
    return (x + m - 1) // m * m


def _rowvec(v):
    return jnp.reshape(jnp.asarray(v, jnp.float32), (1, -1))


class PackedParams(NamedTuple):
    w1c: jax.Array   # (G*cate_num*offset, D1): one-hot -> [cate proj | 0] per group
    w1n: jax.Array   # (G*cont_num,        D1): cont    -> [0 | cont proj] per group
    m1:  jax.Array   # (D1, D1) segment-averaging matrix for LayerNorm #1
    w2:  jax.Array   # (D1, D2) block-diag combine weight
    m2:  jax.Array   # (D2, D2) segment-averaging matrix for LayerNorm #2
    vecs: jax.Array  # (6, max(D1,D2)) packed biases / LN gammas / betas


def choose_group(rows, hidden_dim, max_lanes=128):
    """Largest G dividing `rows` with G*hidden_dim <= 128 (lane-dense output)."""
    for g in (8, 4, 2, 1):
        if rows % g == 0 and g * hidden_dim <= max_lanes:
            return g
    return 1


def prepare_packed_params(params, group):
    """Build packed block-diagonal kernel weights. Call ONCE per parameter set."""
    G = group
    emb = jnp.asarray(params["emb"], jnp.float32)             # (offset, E)
    offset, E = emb.shape
    w_cate = jnp.asarray(params["w_cate"], jnp.float32)       # (C*E, P1)
    P1 = w_cate.shape[1]
    C = w_cate.shape[0] // E
    w_cont = jnp.asarray(params["w_cont"], jnp.float32)       # (cn, P2)
    cn, P2 = w_cont.shape
    w_comb = jnp.asarray(params["w_comb"], jnp.float32)       # (P1+P2, H)
    H = w_comb.shape[1]

    # One-hot/fused-table path only valid for small vocabularies.
    assert C * offset * G <= 4096, (
        "one-hot embedding path needs a gather-based kernel for large vocabs")

    # Tproj[c*offset + o, :] = emb[o] @ w_cate[c*E:(c+1)*E, :]
    tproj = jnp.einsum("oe,cep->cop", emb,
                       w_cate.reshape(C, E, P1)).reshape(C * offset, P1)

    eye = jnp.eye(G, dtype=jnp.float32)
    w1c = jnp.kron(eye, jnp.pad(tproj, ((0, 0), (0, P2))))    # (G*C*offset, D1)
    w1n = jnp.kron(eye, jnp.pad(w_cont, ((0, 0), (P1, 0))))   # (G*cn,       D1)

    seg1 = jnp.zeros((P1 + P2, P1 + P2), jnp.float32)
    seg1 = seg1.at[:P1, :P1].set(1.0 / P1).at[P1:, P1:].set(1.0 / P2)
    m1 = jnp.kron(eye, seg1)                                  # (D1, D1)
    w2 = jnp.kron(eye, w_comb)                                # (D1, D2)
    m2 = jnp.kron(eye, jnp.full((H, H), 1.0 / H, jnp.float32))

    d1, d2 = G * (P1 + P2), G * H
    maxd = max(d1, d2)

    def pack_row(v):
        return jnp.pad(v, ((0, 0), (0, maxd - v.shape[1])))

    def cat1(a, b):
        return jnp.tile(jnp.concatenate([_rowvec(a), _rowvec(b)], axis=1), (1, G))

    vecs = jnp.concatenate(
        [pack_row(cat1(params["b_cate"], params["b_cont"])),
         pack_row(cat1(params["g_cate"], params["g_cont"])),
         pack_row(cat1(params["be_cate"], params["be_cont"])),
         pack_row(jnp.tile(_rowvec(params["b_comb"]), (1, G))),
         pack_row(jnp.tile(_rowvec(params["g_comb"]), (1, G))),
         pack_row(jnp.tile(_rowvec(params["be_comb"]), (1, G)))], axis=0)

    return PackedParams(w1c=w1c, w1n=w1n, m1=m1, w2=w2, m2=m2, vecs=vecs)


def _entire_embedding_kernel(idx_ref, cont_ref, w1c_ref, w1n_ref, m1_ref,
                             w2_ref, m2_ref, vecs_ref, out_ref, *, offset):
    idx = idx_ref[...]                                   # (T, G*C) int32
    T, gc = idx.shape
    gco = w1c_ref.shape[0]                               # G*C*offset
    d1 = w1c_ref.shape[1]                                # G*(P1+P2)
    d2 = w2_ref.shape[1]                                 # G*H

    V = vecs_ref[...]                                    # (6, maxd)
    b1, g1, be1 = V[0:1, :d1], V[1:2, :d1], V[2:3, :d1]
    b2, g2, be2 = V[3:4, :d2], V[4:5, :d2], V[5:6, :d2]

    # --- fused embedding lookup: one (T, G*C*offset) one-hot for all slots ---
    shifts = lax.broadcasted_iota(jnp.int32, (1, gc), 1) * offset
    valid = (idx >= 0) & (idx < offset)                  # OOB index -> zero embedding
    shifted = jnp.where(valid, idx + shifts, -1)         # -1 never matches the iota
    lane = lax.broadcasted_iota(jnp.int32, (T, gco), 1)
    match = lane == shifted[:, 0:1]
    for j in range(1, gc):                               # gc small & static
        match = match | (lane == shifted[:, j:j + 1])
    onehot = match.astype(jnp.float32)                   # (T, G*C*offset)

    # --- cate + cont projections accumulated into one lane-dense (T, D1) ---
    y1 = (jnp.dot(onehot, w1c_ref[...], preferred_element_type=jnp.float32)
          + jnp.dot(cont_ref[...], w1n_ref[...], preferred_element_type=jnp.float32)
          + b1)

    # --- LayerNorm #1 (per 2G lane segments) via segment-averaging matmuls ---
    mu1 = jnp.dot(y1, m1_ref[...], preferred_element_type=jnp.float32)
    xc1 = y1 - mu1
    var1 = jnp.dot(xc1 * xc1, m1_ref[...], preferred_element_type=jnp.float32)
    ln1 = xc1 * lax.rsqrt(var1 + LN_EPS) * g1 + be1

    # --- combine: ReLU -> block-diag Linear -> LayerNorm #2 ---
    comb = jnp.maximum(ln1, 0.0)
    h = jnp.dot(comb, w2_ref[...], preferred_element_type=jnp.float32) + b2
    mu2 = jnp.dot(h, m2_ref[...], preferred_element_type=jnp.float32)
    xc2 = h - mu2
    var2 = jnp.dot(xc2 * xc2, m2_ref[...], preferred_element_type=jnp.float32)
    out_ref[...] = xc2 * lax.rsqrt(var2 + LN_EPS) * g2 + be2


@functools.partial(jax.jit, static_argnames=("group", "offset", "tile_rows"))
def entire_embedding_forward(cate_x, cont_x, packed, *, group, offset,
                             tile_rows=4096):
    B, S, C = cate_x.shape
    cn = cont_x.shape[-1]
    G = group
    d1 = packed.w1c.shape[1]
    d2 = packed.w2.shape[1]
    H = d2 // G
    rows = B * S
    assert rows % G == 0, "use choose_group(B*S, hidden_dim) to pick `group`"
    rows_p = rows // G
    gc, gn = G * C, G * cn

    # Pure row-major views (no HBM pad/slice copies).
    idx2d = cate_x.reshape(rows_p, gc).astype(jnp.int32)
    cont2d = cont_x.reshape(rows_p, gn).astype(jnp.float32)

    # Big tiles amortize the ~0.35us/step grid overhead; keep >=2 grid steps
    # when possible (v7x megacore) and stay well under VMEM limits.
    tile_p = _round_up(max(8, min(tile_rows // G, 4096)), 8)
    if rows_p <= tile_p:
        tile_p = rows_p                                   # single full-array block
    else:
        tile_p = min(tile_p, _round_up(pl.cdiv(rows_p, 2), 8))
    grid = (pl.cdiv(rows_p, tile_p),)                     # ragged tail: Pallas masking

    kernel = functools.partial(_entire_embedding_kernel, offset=offset)

    def row_spec(feat):
        return pl.BlockSpec((tile_p, feat), lambda i: (i, 0))

    def full_spec(arr):
        # Constant index_map: these blocks are only fetched once.
        return pl.BlockSpec(arr.shape, lambda i: (0, 0))

    out2d = pl.pallas_call(
        kernel,
        out_shape=jax.ShapeDtypeStruct((rows_p, d2), jnp.float32),
        grid_spec=pltpu.PrefetchScalarGridSpec(
            num_scalar_prefetch=0,
            grid=grid,
            in_specs=[row_spec(gc), row_spec(gn),
                      full_spec(packed.w1c), full_spec(packed.w1n),
                      full_spec(packed.m1), full_spec(packed.w2),
                      full_spec(packed.m2), full_spec(packed.vecs)],
            out_specs=row_spec(d2),
        ),
        compiler_params=pltpu.CompilerParams(
            dimension_semantics=("parallel",),
            vmem_limit_bytes=48 * 1024 * 1024),
    )(idx2d, cont2d, packed.w1c, packed.w1n, packed.m1,
      packed.w2, packed.m2, packed.vecs)

    return out2d.reshape(B, S, H)


# ----------------------------- reference & setup -----------------------------

def _layernorm(x, gamma, beta):
    mean = jnp.mean(x, axis=-1, keepdims=True)
    var = jnp.mean((x - mean) ** 2, axis=-1, keepdims=True)
    return (x - mean) * lax.rsqrt(var + LN_EPS) * gamma + beta


def init_params(key, *, offset, cate_emb_dim, cate_num, cate_proj_dim,
                cont_num, cont_proj_dim, hidden_dim):
    ks = jax.random.split(key, 8)
    cate_in = cate_emb_dim * cate_num
    comb_in = cate_proj_dim + cont_proj_dim

    emb = 0.1 * jax.random.normal(ks[0], (offset, cate_emb_dim), jnp.float32)
    emb = emb.at[0].set(0.0)                   # padding_idx=0

    def lin(k, fan_in, fan_out):
        bound = 1.0 / np.sqrt(fan_in)
        kw, kb = jax.random.split(k)
        w = jax.random.uniform(kw, (fan_in, fan_out), jnp.float32, -bound, bound)
        b = jax.random.uniform(kb, (1, fan_out), jnp.float32, -bound, bound)
        return w, b

    w_cate, b_cate = lin(ks[1], cate_in, cate_proj_dim)
    w_cont, b_cont = lin(ks[2], cont_num, cont_proj_dim)
    w_comb, b_comb = lin(ks[3], comb_in, hidden_dim)

    g_cate = 1.0 + 0.05 * jax.random.normal(ks[4], (1, cate_proj_dim), jnp.float32)
    be_cate = 0.05 * jax.random.normal(ks[5], (1, cate_proj_dim), jnp.float32)
    g_cont = 1.0 + 0.05 * jax.random.normal(ks[6], (1, cont_proj_dim), jnp.float32)
    be_cont = jnp.zeros((1, cont_proj_dim), jnp.float32)
    g_comb = jnp.ones((1, hidden_dim), jnp.float32)
    be_comb = 0.05 * jax.random.normal(ks[7], (1, hidden_dim), jnp.float32)

    return dict(emb=emb,
                w_cate=w_cate, b_cate=b_cate, g_cate=g_cate, be_cate=be_cate,
                w_cont=w_cont, b_cont=b_cont, g_cont=g_cont, be_cont=be_cont,
                w_comb=w_comb, b_comb=b_comb, g_comb=g_comb, be_comb=be_comb)


def ref_forward(cate_x, cont_x, p):
    B, S, C = cate_x.shape
    emb = p["emb"][cate_x]                     # (B, S, C, E)
    emb = emb.reshape(B, S, -1)
    cate = _layernorm(emb @ p["w_cate"] + p["b_cate"], p["g_cate"], p["be_cate"])
    cont = _layernorm(cont_x @ p["w_cont"] + p["b_cont"], p["g_cont"], p["be_cont"])
    comb = jnp.maximum(jnp.concatenate([cate, cont], axis=-1), 0.0)
    return _layernorm(comb @ p["w_comb"] + p["b_comb"], p["g_comb"], p["be_comb"])


if __name__ == "__main__":
    # args: offset=16, cate_emb_dim=8, cate_num=3, cate_proj_dim=16,
    #       cont_num=4, cont_proj_dim=16, hidden_dim=32, max_seq_len=8, batch=2
    B, S = 2, 8
    offset, cate_emb_dim, cate_num, cate_proj_dim = 16, 8, 3, 16
    cont_num, cont_proj_dim, hidden_dim = 4, 16, 32

    key = jax.random.PRNGKey(0)
    k_idx, k_cont, k_par = jax.random.split(key, 3)

    cate_x = jax.random.randint(k_idx, (B, S, cate_num), 0, offset, dtype=jnp.int32)
    cont_x = jax.random.normal(k_cont, (B, S, cont_num), jnp.float32)

    params = init_params(k_par,
                         offset=offset, cate_emb_dim=cate_emb_dim,
                         cate_num=cate_num, cate_proj_dim=cate_proj_dim,
                         cont_num=cont_num, cont_proj_dim=cont_proj_dim,
                         hidden_dim=hidden_dim)

    G = choose_group(B * S, hidden_dim)                 # =4 -> 128-lane output
    packed = prepare_packed_params(params, G)           # hoisted: once per param set

    out = entire_embedding_forward(cate_x, cont_x, packed, group=G, offset=offset)
    out = jax.block_until_ready(out)

    ref = ref_forward(cate_x, cont_x, params)
    np.testing.assert_allclose(np.asarray(out), np.asarray(ref),
                               rtol=2e-5, atol=2e-5)
    print("KERNEL_OK")
</pallas_src>

<mosaic_0001>
module attributes {stable_mosaic.version = 11 : i64} {
  func.func @_entire_embedding_kernel(%arg0: i32, %arg1: memref<4x12xi32, #tpu.memory_space<vmem>>, %arg2: memref<4x16xf32, #tpu.memory_space<vmem>>, %arg3: memref<192x128xf32, #tpu.memory_space<vmem>>, %arg4: memref<16x128xf32, #tpu.memory_space<vmem>>, %arg5: memref<128x128xf32, #tpu.memory_space<vmem>>, %arg6: memref<128x128xf32, #tpu.memory_space<vmem>>, %arg7: memref<128x128xf32, #tpu.memory_space<vmem>>, %arg8: memref<6x128xf32, #tpu.memory_space<vmem>>, %arg9: memref<4x128xf32, #tpu.memory_space<vmem>>) attributes {dimension_semantics = [#tpu.dimension_semantics<parallel>], iteration_bounds = array<i64: 1>, scalar_prefetch = 0 : i64, scratch_operands = 0 : i64, tpu.core_type = #tpu.core_type<tc>, window_params = [{transform_indices = @transform_0, window_bounds = array<i64: 4, 12>}, {transform_indices = @transform_1, window_bounds = array<i64: 4, 16>}, {pipeline_mode = #tpu.pipeline_mode<synchronous>, transform_indices = @transform_2, window_bounds = array<i64: 192, 128>}, {pipeline_mode = #tpu.pipeline_mode<synchronous>, transform_indices = @transform_3, window_bounds = array<i64: 16, 128>}, {pipeline_mode = #tpu.pipeline_mode<synchronous>, transform_indices = @transform_4, window_bounds = array<i64: 128, 128>}, {pipeline_mode = #tpu.pipeline_mode<synchronous>, transform_indices = @transform_5, window_bounds = array<i64: 128, 128>}, {pipeline_mode = #tpu.pipeline_mode<synchronous>, transform_indices = @transform_6, window_bounds = array<i64: 128, 128>}, {pipeline_mode = #tpu.pipeline_mode<synchronous>, transform_indices = @transform_7, window_bounds = array<i64: 6, 128>}, {transform_indices = @transform_8, window_bounds = array<i64: 4, 128>}]} {
    %c0 = arith.constant 0 : index
    %c0_0 = arith.constant 0 : index
    %0 = vector.load %arg1[%c0, %c0_0] : memref<4x12xi32, #tpu.memory_space<vmem>>, vector<4x12xi32>
    %c0_1 = arith.constant 0 : index
    %c0_2 = arith.constant 0 : index
    %1 = vector.load %arg8[%c0_1, %c0_2] : memref<6x128xf32, #tpu.memory_space<vmem>>, vector<6x128xf32>
    %2 = vector.extract_strided_slice %1 {offsets = [0, 0], sizes = [1, 128], strides = [1, 1]} : vector<6x128xf32> to vector<1x128xf32>
    %3 = vector.extract_strided_slice %1 {offsets = [1, 0], sizes = [1, 128], strides = [1, 1]} : vector<6x128xf32> to vector<1x128xf32>
    %4 = vector.extract_strided_slice %1 {offsets = [2, 0], sizes = [1, 128], strides = [1, 1]} : vector<6x128xf32> to vector<1x128xf32>
    %5 = vector.extract_strided_slice %1 {offsets = [3, 0], sizes = [1, 128], strides = [1, 1]} : vector<6x128xf32> to vector<1x128xf32>
    %6 = vector.extract_strided_slice %1 {offsets = [4, 0], sizes = [1, 128], strides = [1, 1]} : vector<6x128xf32> to vector<1x128xf32>
    %7 = vector.extract_strided_slice %1 {offsets = [5, 0], sizes = [1, 128], strides = [1, 1]} : vector<6x128xf32> to vector<1x128xf32>
    %8 = tpu.iota {dimensions = array<i32: 1>} : vector<1x12xi32>
    %c16_i32 = arith.constant 16 : i32
    %9 = vector.broadcast %c16_i32 : i32 to vector<1x12xi32>
    %10 = arith.muli %8, %9 : vector<1x12xi32>
    %c0_i32 = arith.constant 0 : i32
    %11 = vector.broadcast %c0_i32 : i32 to vector<4x12xi32>
    %12 = arith.cmpi sge, %0, %11 : vector<4x12xi32>
    %c16_i32_3 = arith.constant 16 : i32
    %13 = vector.broadcast %c16_i32_3 : i32 to vector<4x12xi32>
    %14 = arith.cmpi slt, %0, %13 : vector<4x12xi32>
    %15 = arith.andi %12, %14 : vector<4x12xi1>
    %16 = vector.broadcast %10 : vector<1x12xi32> to vector<4x12xi32>
    %17 = arith.addi %0, %16 : vector<4x12xi32>
    %c-1_i32 = arith.constant -1 : i32
    %18 = vector.broadcast %c-1_i32 : i32 to vector<4x12xi32>
    %19 = arith.select %15, %17, %18 : vector<4x12xi1>, vector<4x12xi32>
    %20 = tpu.iota {dimensions = array<i32: 1>} : vector<4x192xi32>
    %21 = vector.extract_strided_slice %19 {offsets = [0, 0], sizes = [4, 1], strides = [1, 1]} : vector<4x12xi32> to vector<4x1xi32>
    %22 = vector.broadcast %21 : vector<4x1xi32> to vector<4x192xi32>
    %23 = arith.cmpi eq, %20, %22 : vector<4x192xi32>
    %24 = vector.extract_strided_slice %19 {offsets = [0, 1], sizes = [4, 1], strides = [1, 1]} : vector<4x12xi32> to vector<4x1xi32>
    %25 = vector.broadcast %24 : vector<4x1xi32> to vector<4x192xi32>
    %26 = arith.cmpi eq, %20, %25 : vector<4x192xi32>
    %27 = arith.ori %23, %26 : vector<4x192xi1>
    %28 = vector.extract_strided_slice %19 {offsets = [0, 2], sizes = [4, 1], strides = [1, 1]} : vector<4x12xi32> to vector<4x1xi32>
    %29 = vector.broadcast %28 : vector<4x1xi32> to vector<4x192xi32>
    %30 = arith.cmpi eq, %20, %29 : vector<4x192xi32>
    %31 = arith.ori %27, %30 : vector<4x192xi1>
    %32 = vector.extract_strided_slice %19 {offsets = [0, 3], sizes = [4, 1], strides = [1, 1]} : vector<4x12xi32> to vector<4x1xi32>
    %33 = vector.broadcast %32 : vector<4x1xi32> to vector<4x192xi32>
    %34 = arith.cmpi eq, %20, %33 : vector<4x192xi32>
    %35 = arith.ori %31, %34 : vector<4x192xi1>
    %36 = vector.extract_strided_slice %19 {offsets = [0, 4], sizes = [4, 1], strides = [1, 1]} : vector<4x12xi32> to vector<4x1xi32>
    %37 = vector.broadcast %36 : vector<4x1xi32> to vector<4x192xi32>
    %38 = arith.cmpi eq, %20, %37 : vector<4x192xi32>
    %39 = arith.ori %35, %38 : vector<4x192xi1>
    %40 = vector.extract_strided_slice %19 {offsets = [0, 5], sizes = [4, 1], strides = [1, 1]} : vector<4x12xi32> to vector<4x1xi32>
    %41 = vector.broadcast %40 : vector<4x1xi32> to vector<4x192xi32>
    %42 = arith.cmpi eq, %20, %41 : vector<4x192xi32>
    %43 = arith.ori %39, %42 : vector<4x192xi1>
    %44 = vector.extract_strided_slice %19 {offsets = [0, 6], sizes = [4, 1], strides = [1, 1]} : vector<4x12xi32> to vector<4x1xi32>
    %45 = vector.broadcast %44 : vector<4x1xi32> to vector<4x192xi32>
    %46 = arith.cmpi eq, %20, %45 : vector<4x192xi32>
    %47 = arith.ori %43, %46 : vector<4x192xi1>
    %48 = vector.extract_strided_slice %19 {offsets = [0, 7], sizes = [4, 1], strides = [1, 1]} : vector<4x12xi32> to vector<4x1xi32>
    %49 = vector.broadcast %48 : vector<4x1xi32> to vector<4x192xi32>
    %50 = arith.cmpi eq, %20, %49 : vector<4x192xi32>
    %51 = arith.ori %47, %50 : vector<4x192xi1>
    %52 = vector.extract_strided_slice %19 {offsets = [0, 8], sizes = [4, 1], strides = [1, 1]} : vector<4x12xi32> to vector<4x1xi32>
    %53 = vector.broadcast %52 : vector<4x1xi32> to vector<4x192xi32>
    %54 = arith.cmpi eq, %20, %53 : vector<4x192xi32>
    %55 = arith.ori %51, %54 : vector<4x192xi1>
    %56 = vector.extract_strided_slice %19 {offsets = [0, 9], sizes = [4, 1], strides = [1, 1]} : vector<4x12xi32> to vector<4x1xi32>
    %57 = vector.broadcast %56 : vector<4x1xi32> to vector<4x192xi32>
    %58 = arith.cmpi eq, %20, %57 : vector<4x192xi32>
    %59 = arith.ori %55, %58 : vector<4x192xi1>
    %60 = vector.extract_strided_slice %19 {offsets = [0, 10], sizes = [4, 1], strides = [1, 1]} : vector<4x12xi32> to vector<4x1xi32>
    %61 = vector.broadcast %60 : vector<4x1xi32> to vector<4x192xi32>
    %62 = arith.cmpi eq, %20, %61 : vector<4x192xi32>
    %63 = arith.ori %59, %62 : vector<4x192xi1>
    %64 = vector.extract_strided_slice %19 {offsets = [0, 11], sizes = [4, 1], strides = [1, 1]} : vector<4x12xi32> to vector<4x1xi32>
    %65 = vector.broadcast %64 : vector<4x1xi32> to vector<4x192xi32>
    %66 = arith.cmpi eq, %20, %65 : vector<4x192xi32>
    %67 = arith.ori %63, %66 : vector<4x192xi1>
    %68 = arith.extui %67 : vector<4x192xi1> to vector<4x192xi32>
    %69 = arith.sitofp %68 : vector<4x192xi32> to vector<4x192xf32>
    %c0_4 = arith.constant 0 : index
    %c0_5 = arith.constant 0 : index
    %70 = vector.load %arg3[%c0_4, %c0_5] : memref<192x128xf32, #tpu.memory_space<vmem>>, vector<192x128xf32>
    %cst = arith.constant dense<0.000000e+00> : vector<4x128xf32>
    %71 = tpu.matmul %69, %70, %cst {dimension_numbers = #tpu.dot_dimension_numbers<[1], [0], [0], [1], [0, 0, 1, 1], [], []>} : vector<4x192xf32>, vector<192x128xf32>, vector<4x128xf32> -> vector<4x128xf32>
    %c0_6 = arith.constant 0 : index
    %c0_7 = arith.constant 0 : index
    %72 = vector.load %arg2[%c0_6, %c0_7] : memref<4x16xf32, #tpu.memory_space<vmem>>, vector<4x16xf32>
    %c0_8 = arith.constant 0 : index
    %c0_9 = arith.constant 0 : index
    %73 = vector.load %arg4[%c0_8, %c0_9] : memref<16x128xf32, #tpu.memory_space<vmem>>, vector<16x128xf32>
    %cst_10 = arith.constant dense<0.000000e+00> : vector<4x128xf32>
    %74 = tpu.matmul %72, %73, %cst_10 {dimension_numbers = #tpu.dot_dimension_numbers<[1], [0], [0], [1], [0, 0, 1, 1], [], []>} : vector<4x16xf32>, vector<16x128xf32>, vector<4x128xf32> -> vector<4x128xf32>
    %75 = arith.addf %71, %74 : vector<4x128xf32>
    %76 = vector.broadcast %2 : vector<1x128xf32> to vector<4x128xf32>
    %77 = arith.addf %75, %76 : vector<4x128xf32>
    %c0_11 = arith.constant 0 : index
    %c0_12 = arith.constant 0 : index
    %78 = vector.load %arg5[%c0_11, %c0_12] : memref<128x128xf32, #tpu.memory_space<vmem>>, vector<128x128xf32>
    %cst_13 = arith.constant dense<0.000000e+00> : vector<4x128xf32>
    %79 = tpu.matmul %77, %78, %cst_13 {dimension_numbers = #tpu.dot_dimension_numbers<[1], [0], [0], [1], [0, 0, 1, 1], [], []>} : vector<4x128xf32>, vector<128x128xf32>, vector<4x128xf32> -> vector<4x128xf32>
    %80 = arith.subf %77, %79 : vector<4x128xf32>
    %81 = arith.mulf %80, %80 : vector<4x128xf32>
    %c0_14 = arith.constant 0 : index
    %c0_15 = arith.constant 0 : index
    %82 = vector.load %arg5[%c0_14, %c0_15] : memref<128x128xf32, #tpu.memory_space<vmem>>, vector<128x128xf32>
    %cst_16 = arith.constant dense<0.000000e+00> : vector<4x128xf32>
    %83 = tpu.matmul %81, %82, %cst_16 {dimension_numbers = #tpu.dot_dimension_numbers<[1], [0], [0], [1], [0, 0, 1, 1], [], []>} : vector<4x128xf32>, vector<128x128xf32>, vector<4x128xf32> -> vector<4x128xf32>
    %cst_17 = arith.constant 9.99999974E-6 : f32
    %84 = vector.broadcast %cst_17 : f32 to vector<4x128xf32>
    %85 = arith.addf %83, %84 : vector<4x128xf32>
    %86 = math.rsqrt %85 : vector<4x128xf32>
    %87 = arith.mulf %80, %86 : vector<4x128xf32>
    %88 = vector.broadcast %3 : vector<1x128xf32> to vector<4x128xf32>
    %89 = arith.mulf %87, %88 : vector<4x128xf32>
    %90 = vector.broadcast %4 : vector<1x128xf32> to vector<4x128xf32>
    %91 = arith.addf %89, %90 : vector<4x128xf32>
    %cst_18 = arith.constant 0.000000e+00 : f32
    %92 = vector.broadcast %cst_18 : f32 to vector<4x128xf32>
    %93 = arith.maximumf %91, %92 : vector<4x128xf32>
    %c0_19 = arith.constant 0 : index
    %c0_20 = arith.constant 0 : index
    %94 = vector.load %arg6[%c0_19, %c0_20] : memref<128x128xf32, #tpu.memory_space<vmem>>, vector<128x128xf32>
    %cst_21 = arith.constant dense<0.000000e+00> : vector<4x128xf32>
    %95 = tpu.matmul %93, %94, %cst_21 {dimension_numbers = #tpu.dot_dimension_numbers<[1], [0], [0], [1], [0, 0, 1, 1], [], []>} : vector<4x128xf32>, vector<128x128xf32>, vector<4x128xf32> -> vector<4x128xf32>
    %96 = vector.broadcast %5 : vector<1x128xf32> to vector<4x128xf32>
    %97 = arith.addf %95, %96 : vector<4x128xf32>
    %c0_22 = arith.constant 0 : index
    %c0_23 = arith.constant 0 : index
    %98 = vector.load %arg7[%c0_22, %c0_23] : memref<128x128xf32, #tpu.memory_space<vmem>>, vector<128x128xf32>
    %cst_24 = arith.constant dense<0.000000e+00> : vector<4x128xf32>
    %99 = tpu.matmul %97, %98, %cst_24 {dimension_numbers = #tpu.dot_dimension_numbers<[1], [0], [0], [1], [0, 0, 1, 1], [], []>} : vector<4x128xf32>, vector<128x128xf32>, vector<4x128xf32> -> vector<4x128xf32>
    %100 = arith.subf %97, %99 : vector<4x128xf32>
    %101 = arith.mulf %100, %100 : vector<4x128xf32>
    %c0_25 = arith.constant 0 : index
    %c0_26 = arith.constant 0 : index
    %102 = vector.load %arg7[%c0_25, %c0_26] : memref<128x128xf32, #tpu.memory_space<vmem>>, vector<128x128xf32>
    %cst_27 = arith.constant dense<0.000000e+00> : vector<4x128xf32>
    %103 = tpu.matmul %101, %102, %cst_27 {dimension_numbers = #tpu.dot_dimension_numbers<[1], [0], [0], [1], [0, 0, 1, 1], [], []>} : vector<4x128xf32>, vector<128x128xf32>, vector<4x128xf32> -> vector<4x128xf32>
    %cst_28 = arith.constant 9.99999974E-6 : f32
    %104 = vector.broadcast %cst_28 : f32 to vector<4x128xf32>
    %105 = arith.addf %103, %104 : vector<4x128xf32>
    %106 = math.rsqrt %105 : vector<4x128xf32>
    %107 = arith.mulf %100, %106 : vector<4x128xf32>
    %108 = vector.broadcast %6 : vector<1x128xf32> to vector<4x128xf32>
    %109 = arith.mulf %107, %108 : vector<4x128xf32>
    %110 = vector.broadcast %7 : vector<1x128xf32> to vector<4x128xf32>
    %111 = arith.addf %109, %110 : vector<4x128xf32>
    %c0_29 = arith.constant 0 : index
    %c0_30 = arith.constant 0 : index
    %112 = vector.load %arg9[%c0_29, %c0_30] : memref<4x128xf32, #tpu.memory_space<vmem>>, vector<4x128xf32>
    tpu.vector_store %arg9[%c0_29, %c0_30], %111 {strides = array<i32>} : memref<4x128xf32, #tpu.memory_space<vmem>>, vector<4x128xf32>,
    return
  }
  func.func @transform_0(%arg0: i32) -> (i32, i32) {
    %c0_i32 = arith.constant 0 : i32
    %c0_i32_0 = arith.constant 0 : i32
    return %arg0, %c0_i32 : i32, i32
  }
  func.func @transform_1(%arg0: i32) -> (i32, i32) {
    %c0_i32 = arith.constant 0 : i32
    %c0_i32_0 = arith.constant 0 : i32
    return %arg0, %c0_i32 : i32, i32
  }
  func.func @transform_2(%arg0: i32) -> (i32, i32) {
    %c0_i32 = arith.constant 0 : i32
    %c0_i32_0 = arith.constant 0 : i32
    %c0_i32_1 = arith.constant 0 : i32
    return %c0_i32, %c0_i32_0 : i32, i32
  }
  func.func @transform_3(%arg0: i32) -> (i32, i32) {
    %c0_i32 = arith.constant 0 : i32
    %c0_i32_0 = arith.constant 0 : i32
    %c0_i32_1 = arith.constant 0 : i32
    return %c0_i32, %c0_i32_0 : i32, i32
  }
  func.func @transform_4(%arg0: i32) -> (i32, i32) {
    %c0_i32 = arith.constant 0 : i32
    %c0_i32_0 = arith.constant 0 : i32
    %c0_i32_1 = arith.constant 0 : i32
    return %c0_i32, %c0_i32_0 : i32, i32
  }
  func.func @transform_5(%arg0: i32) -> (i32, i32) {
    %c0_i32 = arith.constant 0 : i32
    %c0_i32_0 = arith.constant 0 : i32
    %c0_i32_1 = arith.constant 0 : i32
    return %c0_i32, %c0_i32_0 : i32, i32
  }
  func.func @transform_6(%arg0: i32) -> (i32, i32) {
    %c0_i32 = arith.constant 0 : i32
    %c0_i32_0 = arith.constant 0 : i32
    %c0_i32_1 = arith.constant 0 : i32
    return %c0_i32, %c0_i32_0 : i32, i32
  }
  func.func @transform_7(%arg0: i32) -> (i32, i32) {
    %c0_i32 = arith.constant 0 : i32
    %c0_i32_0 = arith.constant 0 : i32
    %c0_i32_1 = arith.constant 0 : i32
    return %c0_i32, %c0_i32_0 : i32, i32
  }
  func.func @transform_8(%arg0: i32) -> (i32, i32) {
    %c0_i32 = arith.constant 0 : i32
    %c0_i32_0 = arith.constant 0 : i32
    return %arg0, %c0_i32 : i32, i32
  }
}

</mosaic_0001>

<bundles_post_ra>
// kernel: entire_embedding_forward.1
= control target key start
LH: loop header
LB: loop body
LE: loop exit
PB: predicated region body
PF: predicated region fallthrough
CT: control target
= control target key end

     0   :  { %13 = vsyncpa [#allocation3], 0  ;;  %s1670_s0 = inlined_call_operand.vmem [shape: s32[4,12], index: 0, kind: input, shape index: {}]   ;;  %s1671_s1 = inlined_call_operand.vmem [shape: f32[4,16], index: 1, kind: input, shape index: {}]   ;;  %s1672_s2 = inlined_call_operand.hbm [shape: f32[192,128], index: 2, kind: input, shape index: {}]   ;;  %s1673_s3 = inlined_call_operand.vmem [shape: f32[16,128], index: 3, kind: input, shape index: {}]   ;;  %s1674_s4 = inlined_call_operand.hbm [shape: f32[128,128], index: 4, kind: input, shape index: {}]   ;;  %s1675_s5 = inlined_call_operand.hbm [shape: f32[128,128], index: 5, kind: input, shape index: {}]   ;;  %s1676_s6 = inlined_call_operand.hbm [shape: f32[128,128], index: 6, kind: input, shape index: {}]   ;;  %s1677_s7 = inlined_call_operand.vmem [shape: f32[6,128], index: 7, kind: input, shape index: {}]   ;;  %s1678_s8 = inlined_call_operand.vmem [shape: f32[4,128], index: 8, kind: output, shape index: {}]  }
   0x1   :  { %14 = vsyncpa [#allocation5], 0 }
   0x2   :  { %15 = vsyncpa [#allocation8], 0  ;;  %s1364_s27 = smov [#allocation4]   ;;  %s1365_s29 = smov [#allocation2]  }
   0x3   :  { %s39_s28 = sshll.u32 %s1364_s27, 4  ;;  %s25_s30 = sshll.u32 %s1365_s29, 4  ;;  %s40_s28 = int_to_ptr.vmem [resolvable:$true] %s39_s28  ;;  %s1430_s30 = int_to_ptr.vmem [resolvable:$true] %s25_s30 }
   0x4   :  { %s1270_s11 = scalar_lea.hbm %s1674_s4, 2048 }
   0x5   :  { %p1271_p0 = scmp.ne.s32.totalorder %s1674_s4, %s1270_s11  ;;  %p1274_p1 = scmp.lt.u32.totalorder %s1270_s11, %s1674_s4 }
   0x7   :  { %p1276_p2 = pnand %p1274_p1, %p1271_p0 }
   0x9   :  { %1279 = shalt.err (!%p1276_p2)
}
   0xa   :  { %s1280_s16 = scalar_lea.vmem %s40_s28, 2048  ;;  %p1285_p4 = scmp.lt.s32.totalorder %s40_s28, %s40_s28 }
   0xb   :  { %p1281_p3 = scmp.ne.s32.totalorder %s40_s28, %s1280_s16  ;;  %p1286_p5 = scmp.lt.s32.totalorder %s1280_s16, %s1280_s16 }
   0xd   :  { %p1287_p6 = por %p1286_p5, %p1285_p4 }
   0xf   :  { %p1288_p7 = pnand %p1287_p6, %p1281_p3 }
  0x11   :  { %1291 = shalt.err (!%p1288_p7)
}
  0x12   :  { %s1366_s17 = smov 128   ;;  %s1367_s18 = smov 8  }
  0x13   :  { %45 = dma.hbm_to_vmem [thread:$0]  %s1674_s4, 2048, %s40_s28, [#allocation5], %s1366_s17, %s1366_s17, %s1367_s18  }
  0x14   :  { %s1292_s23 = scalar_lea.hbm %s1672_s2, 3072 }
  0x15   :  { %p1293_p8 = scmp.ne.s32.totalorder %s1672_s2, %s1292_s23  ;;  %p1296_p9 = scmp.lt.u32.totalorder %s1292_s23, %s1672_s2 }
  0x17   :  { %p1298_p10 = pnand %p1296_p9, %p1293_p8 }
  0x19   :  { %1301 = shalt.err (!%p1298_p10)
}
  0x1a   :  { %s1302_s29 = scalar_lea.vmem %s1430_s30, 3072  ;;  %p1307_p12 = scmp.lt.s32.totalorder %s1430_s30, %s1430_s30 }
  0x1b   :  { %p1303_p11 = scmp.ne.s32.totalorder %s1430_s30, %s1302_s29  ;;  %p1308_p13 = scmp.lt.s32.totalorder %s1302_s29, %s1302_s29 }
  0x1d   :  { %p1309_p0 = por %p1308_p13, %p1307_p12 }
  0x1f   :  { %p1310_p1 = pnand %p1309_p0, %p1303_p11 }
  0x21   :  { %1313 = shalt.err (!%p1310_p1)
}
  0x22   :  { %31 = dma.hbm_to_vmem [thread:$0]  %s1672_s2, 3072, %s1430_s30, [#allocation3], %s1366_s17, %s1366_s17, %s1367_s18  }
  0x23   :  { %s1368_s9 = smov [#allocation6]   ;;  %s1369_s11 = smov [#allocation7]  }
  0x24   :  { %s51_s10 = sshll.u32 %s1368_s9, 4  ;;  %s63_s12 = sshll.u32 %s1369_s11, 4  ;;  %s52_s10 = int_to_ptr.vmem [resolvable:$true] %s51_s10  ;;  %s1467_s12 = int_to_ptr.vmem [resolvable:$true] %s63_s12 }
  0x25   :  { %s1314_s15 = scalar_lea.hbm %s1675_s5, 2048 }
  0x26   :  { %p1315_p2 = scmp.ne.s32.totalorder %s1675_s5, %s1314_s15  ;;  %p1318_p3 = scmp.lt.u32.totalorder %s1314_s15, %s1675_s5 }
  0x28   :  { %p1320_p4 = pnand %p1318_p3, %p1315_p2 }
  0x2a   :  { %1323 = shalt.err (!%p1320_p4)
}
  0x2b   :  { %s1324_s2 = scalar_lea.vmem %s52_s10, 2048  ;;  %p1329_p6 = scmp.lt.s32.totalorder %s52_s10, %s52_s10 }
  0x2c   :  { %p1325_p5 = scmp.ne.s32.totalorder %s52_s10, %s1324_s2  ;;  %p1330_p7 = scmp.lt.s32.totalorder %s1324_s2, %s1324_s2 }
  0x2e   :  { %p1331_p8 = por %p1330_p7, %p1329_p6 }
  0x30   :  { %p1332_p9 = pnand %p1331_p8, %p1325_p5 }
  0x32   :  { %1335 = shalt.err (!%p1332_p9)
}
  0x33   :  { %57 = dma.hbm_to_vmem [thread:$0]  %s1675_s5, 2048, %s52_s10, [#allocation5], %s1366_s17, %s1366_s17, %s1367_s18  }
  0x34   :  { %s1336_s25 = scalar_lea.hbm %s1676_s6, 2048 }
  0x35   :  { %p1337_p10 = scmp.ne.s32.totalorder %s1676_s6, %s1336_s25  ;;  %p1340_p11 = scmp.lt.u32.totalorder %s1336_s25, %s1676_s6 }
  0x37   :  { %p1342_p12 = pnand %p1340_p11, %p1337_p10 }
  0x39   :  { %1345 = shalt.err (!%p1342_p12)
}
  0x3a   :  { %s1346_s28 = scalar_lea.vmem %s1467_s12, 2048  ;;  %p1351_p0 = scmp.lt.s32.totalorder %s1467_s12, %s1467_s12 }
  0x3b   :  { %p1347_p13 = scmp.ne.s32.totalorder %s1467_s12, %s1346_s28  ;;  %p1352_p1 = scmp.lt.s32.totalorder %s1346_s28, %s1346_s28 }
  0x3d   :  { %p1353_p2 = por %p1352_p1, %p1351_p0 }
  0x3f   :  { %p1354_p3 = pnand %p1353_p2, %p1347_p13 }
  0x41   :  { %1357 = shalt.err (!%p1354_p3)
}
  0x42   :  { %69 = dma.hbm_to_vmem [thread:$0]  %s1676_s6, 2048, %s1467_s12, [#allocation8], %s1366_s17, %s1366_s17, %s1367_s18  }
  0x43   :  { %1358 = dma.done.wait [#allocation3], 3072  }
  0x44   :  { %1359 = vsyncadd [#allocation3], 4294964224 }
  0x45   :  { %1360 = dma.done.wait [#allocation5], 4096  }
  0x46   :  { %1361 = vsyncadd [#allocation5], 4294963200 }
  0x47   :  { %1362 = dma.done.wait [#allocation8], 2048  }
  0x48   :  { %1363 = vsyncadd [#allocation8], 4294965248  ;;  %v86_v0 = vlaneseq  ;;  %v1370_v1 = vmov 2   ;;  %v1371_v2 = vmov 0   ;;  %v1372_v5 = vmov 0.0|0.0   ;;  %v181_v7 = vld [vmem:[#allocation2] sm:$0xff] }
  0x49   :  { %1256 = vset.pattern.permute.xlu1 %v1370_v1  ;;  %1254 = vset.pattern.permute.xlu0 %v1371_v2  ;;  %v84_v6 = vld [vmem:[%s1670_s0] sm:$0xf]  ;;  %v182_v8 = vld [vmem:[#allocation2 + $0x8] sm:$0xff]  ;;  %v183_v11 = vld [vmem:[#allocation2 + $0x10] sm:$0xff]  ;;  %v1373_v18 = vmov 3   ;;  %v1374_v19 = vmov 1  }
  0x4a   :  { %v1505_v3 = vand.u32 127, %v86_v0  ;;  %1077 = vmatprep.subr.bf16.mxu1 %v1372_v5  ;;  %1074 = vmatprep.subr.bf16.mxu0 %v1372_v5  ;;  %vm89_vm0 = vcmp.ge.s32.totalorder %v84_v6, 0  ;;  %vm90_vm1 = vcmp.lt.s32.totalorder %v84_v6, 16  ;;  %v1078_v10 = vpack.c.bf16 %v182_v8, %v181_v7  ;;  %v184_v12 = vld [vmem:[#allocation2 + $0x18] sm:$0xff]  ;;  %v185_v15 = vld [vmem:[#allocation2 + $0x20] sm:$0xff]  ;;  %v186_v16 = vld [vmem:[#allocation2 + $0x28] sm:$0xff] }
  0x4b   :  { %vm91_vm2 = vmand %vm89_vm0, %vm90_vm1  ;;  %v1081_v14 = vpack.c.bf16 %v184_v12, %v183_v11  ;;  %v1084_v17 = vpack.c.bf16 %v186_v16, %v185_v15  ;;  %v187_v20 = vld [vmem:[#allocation2 + $0x30] sm:$0xff]  ;;  %v188_v21 = vld [vmem:[#allocation2 + $0x38] sm:$0xff]  ;;  %v1375_v23 = vmov 4   ;;  %v1376_v24 = vmov 5  }
  0x4c   :  { %v88_v4 = vmul.u32 16, %v1505_v3  ;;  %1079 = vmatpush1.bf16.msra.mxu1 %v1078_v10  ;;  %v1087_v22 = vpack.c.bf16 %v188_v21, %v187_v20  ;;  %v189_v25 = vld [vmem:[#allocation2 + $0x40] sm:$0xff]  ;;  %v190_v26 = vld [vmem:[#allocation2 + $0x48] sm:$0xff]  ;;  %v1377_v28 = vmov 6   ;;  %v1378_v29 = vmov 8   ;;  %v191_v30 = vld [vmem:[#allocation2 + $0x50] sm:$0xff] }
  0x4d   :  { %1080 = vmatprep.subr.bf16.mxu1 %v1372_v5  ;;  %v1090_v27 = vpack.c.bf16 %v190_v26, %v189_v25  ;;  %v192_v31 = vld [vmem:[#allocation2 + $0x58] sm:$0xff]  ;;  %v193_v33 = vld [vmem:[#allocation2 + $0x60] sm:$0xff]  ;;  %v194_v34 = vld [vmem:[#allocation2 + $0x68] sm:$0xff]  ;;  %v1379_v35 = vmov 7   ;;  %v1380_v36 = vmov 11   ;;  %v1381_v40 = vmov 9  }
  0x4e   :  { %v92_v9 = vadd.s32 %v88_v4, %v84_v6  ;;  %v1093_v32 = vpack.c.bf16 %v192_v31, %v191_v30  ;;  %v1096_v37 = vpack.c.bf16 %v194_v34, %v193_v33  ;;  %v195_v38 = vld [vmem:[#allocation2 + $0x70] sm:$0xff]  ;;  %v196_v39 = vld [vmem:[#allocation2 + $0x78] sm:$0xff]  ;;  %v197_v42 = vld [vmem:[#allocation2 + $0x80] sm:$0xff]  ;;  %v1382_v44 = vmov 10  }
  0x4f   :  { %v1099_v41 = vpack.c.bf16 %v196_v39, %v195_v38  ;;  %v198_v43 = vld [vmem:[#allocation2 + $0x88] sm:$0xff]  ;;  %v199_v46 = vld [vmem:[#allocation2 + $0x90] sm:$0xff]  ;;  %v200_v47 = vld [vmem:[#allocation2 + $0x98] sm:$0xff]  ;;  %vm208_vm3 = vcmask 130048   ;;  %vm1679_vm4 = vmmov 0   ;;  %v1384_v55 = vmov 0.0  }
  0x50   :  { %v1513_v13 = vsel %vm91_vm2, %v92_v9, 4294967295  ;;  %1082 = vmatpush1.bf16.msra.mxu1 %v1081_v14  ;;  %v1102_v45 = vpack.c.bf16 %v198_v43, %v197_v42  ;;  %v206_v48 = vld [vmem:[%s1673_s3] sm:$0xff]  ;;  %v207_v49 = vld [vmem:[%s1673_s3 + $0x8] sm:$0xff]  ;;  %v1105_v51 = vpack.c.bf16 %v200_v47, %v199_v46  ;;  %v202_v53 = vld [vmem:[#allocation2 + $0xa8] sm:$0xff]  ;;  %896 = vmatprep.mubr.msk.f32.mxu0 %vm1679_vm4, %v1384_v55  ;;  %v1600_v39 = vshrl.u32 %v86_v0, 7 }
  0x51   :  { %108 = vperm.xlu1 %1256, %v1513_v13   ;;  %96 = vperm.xlu0 %1254, %v1513_v13   ;;  %v1075_v50 = vpack.c.bf16 %v207_v49, %v206_v48  ;;  %v201_v52 = vld [vmem:[#allocation2 + $0xa0] sm:$0xff]  ;;  %v205_v54 = vld [vmem:[%s1671_s1] sm:$0xf]  ;;  %v362_v58 = vld [vmem:[#allocation4 + $0x8] sm:$0xff] }
  0x52   :  { %1083 = vmatprep.subr.bf16.mxu1 %v1372_v5  ;;  %v1108_v56 = vpack.c.bf16 %v202_v53, %v201_v52  ;;  %v361_v57 = vld [vmem:[#allocation4] sm:$0xff]  ;;  %v363_v59 = vld [vmem:[#allocation4 + $0x10] sm:$0xff]  ;;  %v204_v61 = vld [vmem:[#allocation2 + $0xb8] sm:$0xff] }
  0x53   :  { %1076 = vmatpush3.bf16.msra.mxu0 %v1075_v50  ;;  %v203_v60 = vld [vmem:[#allocation2 + $0xb0] sm:$0xff]  ;;  %v1549_v62 = vpack.c.bf16 %v362_v58, %v361_v57  ;;  %v364_v63 = vld [vmem:[#allocation4 + $0x18] sm:$0xff]  ;;  %v365_v4 = vld [vmem:[#allocation4 + $0x20] sm:$0xff] }
  0x54   :  { %1085 = vmatpush1.bf16.msra.mxu1 %v1084_v17  ;;  %1113 = vmatprep.subr.bf16.mxu0 %v1372_v5  ;;  %v1554_v1 = vpack.c.bf16 %v364_v63, %v363_v59  ;;  %v1111_v2 = vpack.c.bf16 %v204_v61, %v203_v60  ;;  %v366_v6 = vld [vmem:[#allocation4 + $0x28] sm:$0xff]  ;;  %v367_v8 = vld [vmem:[#allocation4 + $0x30] sm:$0xff]  ;;  %v368_v9 = vld [vmem:[#allocation4 + $0x38] sm:$0xff] }
  0x55   :  { %1257 = vset.pattern.permute.xlu1 %v1373_v18  ;;  %1255 = vset.pattern.permute.xlu0 %v1374_v19  ;;  %v1559_v7 = vpack.c.bf16 %v366_v6, %v365_v4  ;;  %v1564_v10 = vpack.c.bf16 %v368_v9, %v367_v8  ;;  %v369_v11 = vld [vmem:[#allocation4 + $0x40] sm:$0xff]  ;;  %v370_v12 = vld [vmem:[#allocation4 + $0x48] sm:$0xff]  ;;  %v371_v14 = vld [vmem:[#allocation4 + $0x50] sm:$0xff] }
  0x56   :  { %115 = vperm.xlu1 %1257, %v1513_v13   ;;  %101 = vperm.xlu0 %1255, %v1513_v13   ;;  %v372_v15 = vld [vmem:[#allocation4 + $0x58] sm:$0xff]  ;;  %v373_v17 = vld [vmem:[#allocation4 + $0x60] sm:$0xff]  ;;  %v374_v18 = vld [vmem:[#allocation4 + $0x68] sm:$0xff] }
  0x57   :  { %1086 = vmatprep.subr.bf16.mxu1 %v1372_v5  ;;  %897 = vmatmul.mubr.msk.f32.vlgmr.msra.gmra.mrb[0].mxu0 %vm208_vm3, %v205_v54  ;;  %v1572_v16 = vpack.c.bf16 %v372_v15, %v371_v14  ;;  %v1576_v19 = vpack.c.bf16 %v374_v18, %v373_v17  ;;  %v532_v0 = vld [vmem:[#allocation6] sm:$0xff]  ;;  %v533_v47 = vld [vmem:[#allocation6 + $0x8] sm:$0xff]  ;;  %v534_v48 = vld [vmem:[#allocation6 + $0x10] sm:$0xff] }
  0x58   :  { %1088 = vmatpush1.bf16.msra.mxu1 %v1087_v22  ;;  %931 = vmatprep.mubr.msk.f32.mxu0 %vm1679_vm4, %v1384_v55  ;;  %v1162_v49 = vpack.c.bf16 %v533_v47, %v532_v0  ;;  %v535_v50 = vld [vmem:[#allocation6 + $0x18] sm:$0xff]  ;;  %v536_v52 = vld [vmem:[#allocation6 + $0x20] sm:$0xff]  ;;  %v537_v53 = vld [vmem:[#allocation6 + $0x28] sm:$0xff] }
  0x59   :  { %1089 = vmatprep.subr.bf16.mxu1 %v1372_v5  ;;  %1115 = vmatpush3.bf16.msra.mxu0 %v1549_v62  ;;  %v1168_v54 = vpack.c.bf16 %v537_v53, %v536_v52  ;;  %v538_v60 = vld [vmem:[#allocation6 + $0x30] sm:$0xff]  ;;  %v539_v61 = vld [vmem:[#allocation6 + $0x38] sm:$0xff]  ;;  %v540_v63 = vld [vmem:[#allocation6 + $0x40] sm:$0xff] }
  0x5a   :  { %1258 = vset.pattern.permute.xlu1 %v1375_v23  ;;  %1259 = vset.pattern.permute.xlu0 %v1376_v24  ;;  %v94_v24 = vadd.s32 128, %v1505_v3  ;;  %v542_v4 = vld [vmem:[#allocation6 + $0x50] sm:$0xff]  ;;  %v543_v6 = vld [vmem:[#allocation6 + $0x58] sm:$0xff]  ;;  %v544_v8 = vld [vmem:[#allocation6 + $0x60] sm:$0xff] }
  0x5b   :  { %122 = vperm.xlu1 %1258, %v1513_v13   ;;  %129 = vperm.xlu0 %1259, %v1513_v13   ;;  %v545_v9 = vld [vmem:[#allocation6 + $0x68] sm:$0xff]  ;;  %v622_v14 = vld [vmem:[#allocation7] sm:$0xff]  ;;  %v625_v18 = vld [vmem:[#allocation7 + $0x18] sm:$0xff] }
  0x5c   :  { %1091 = vmatpush1.bf16.msra.mxu1 %v1090_v27  ;;  %1116 = vmatprep.subr.bf16.mxu0 %v1372_v5  ;;  %v623_v15 = vld [vmem:[#allocation7 + $0x8] sm:$0xff]  ;;  %v637_v47 = vld [vmem:[#allocation7 + $0x78] sm:$0xff] }
  0x5d   :  { %1092 = vmatprep.subr.bf16.mxu1 %v1372_v5  ;;  %1118 = vmatpush3.bf16.msra.mxu0 %v1554_v1  ;;  %v1186_v17 = vpack.c.bf16 %v623_v15, %v622_v14 }
  0x5e   :  { %1119 = vmatprep.subr.bf16.mxu0 %v1372_v5 }
  0x5f   :  { %1260 = vset.pattern.permute.xlu1 %v1377_v28  ;;  %1262 = vset.pattern.permute.xlu0 %v1378_v29 }
  0x60   :  { %136 = vperm.xlu1 %1260, %v1513_v13   ;;  %150 = vperm.xlu0 %1262, %v1513_v13  }
  0x61   :  { %1094 = vmatpush1.bf16.msra.mxu1 %v1093_v32  ;;  %1121 = vmatpush3.bf16.msra.mxu0 %v1559_v7 }
  0x62   :  { %1095 = vmatprep.subr.bf16.mxu1 %v1372_v5  ;;  %1122 = vmatprep.subr.bf16.mxu0 %v1372_v5 }
  0x64   :  { %1261 = vset.pattern.permute.xlu1 %v1379_v35  ;;  %1265 = vset.pattern.permute.xlu0 %v1380_v36  ;;  %v375_v36 = vld [vmem:[#allocation4 + $0x70] sm:$0xff] }
  0x65   :  { %143 = vperm.xlu1 %1261, %v1513_v13   ;;  %171 = vperm.xlu0 %1265, %v1513_v13  }
  0x66   :  { %1097 = vmatpush1.bf16.msra.mxu1 %v1096_v37  ;;  %1124 = vmatpush3.bf16.msra.mxu0 %v1564_v10  ;;  %v376_v37 = vld [vmem:[#allocation4 + $0x78] sm:$0xff] }
  0x67   :  { %1098 = vmatprep.subr.bf16.mxu1 %v1372_v5  ;;  %1125 = vmatprep.subr.bf16.mxu0 %v1372_v5 }
  0x69   :  { %1263 = vset.pattern.permute.xlu1 %v1381_v40  ;;  %v358_v40 = vsub.s32 0, %v1600_v39 }
  0x6a   :  { %157 = vperm.xlu1 %1263, %v1513_v13   ;;  %1100 = vmatpush1.bf16.msra.mxu1 %v1099_v41  ;;  %v1606_v41 = vld [vmem:[%s1677_s7] sm:$0x3f] }
  0x6b   :  { %1101 = vmatprep.subr.bf16.mxu1 %v1372_v5  ;;  %v359_v42 = vrot.slane %v1606_v41, %v358_v40 }
  0x6e   :  { %1264 = vset.pattern.permute.xlu1 %v1382_v44  ;;  %1103 = vmatpush1.bf16.msra.mxu1 %v1102_v45 }
  0x6f   :  { %164 = vperm.xlu1 %1264, %v1513_v13   ;;  %1104 = vmatprep.subr.bf16.mxu1 %v1372_v5  ;;  %v1568_v13 = vpack.c.bf16 %v370_v12, %v369_v11  ;;  %v546_v11 = vld [vmem:[#allocation6 + $0x70] sm:$0xff]  ;;  %v547_v12 = vld [vmem:[#allocation6 + $0x78] sm:$0xff] }
  0x71   :  { %1127 = vmatpush3.bf16.msra.mxu0 %v1568_v13 }
  0x72   :  { %1106 = vmatpush1.bf16.msra.mxu1 %v1105_v51  ;;  %1128 = vmatprep.subr.bf16.mxu0 %v1372_v5  ;;  %v1165_v51 = vpack.c.bf16 %v535_v50, %v534_v48 }
  0x73   :  { %1107 = vmatprep.subr.bf16.mxu1 %v1372_v5 }
  0x75   :  { %1130 = vmatpush3.bf16.msra.mxu0 %v1572_v16 }
  0x76   :  { %1109 = vmatpush1.bf16.msra.mxu1 %v1108_v56  ;;  %1131 = vmatprep.subr.bf16.mxu0 %v1372_v5 }
  0x77   :  { %1110 = vmatprep.subr.bf16.mxu1 %v1372_v5 }
  0x79   :  { %1133 = vmatpush3.bf16.msra.mxu0 %v1576_v19 }
  0x7a   :  { %1112 = vmatpush1.bf16.msra.mxu1 %v1111_v2  ;;  %1134 = vmatprep.subr.bf16.mxu0 %v1372_v5 }
  0x7b   :  { %1161 = vmatprep.subr.bf16.mxu1 %v1372_v5 }
  0xd0   :  { %v109_v20 = vpop.permute.xlu1 %108  ;;  %v97_v21 = vpop.permute.xlu0 %96 }
  0xd1   :  { %vm98_vm5 = vcmp.eq.s32.totalorder %v1505_v3, %v97_v21  ;;  %vm99_vm7 = vcmp.eq.s32.totalorder %v94_v24, %v97_v21  ;;  %vm110_vm11 = vcmp.eq.s32.totalorder %v1505_v3, %v109_v20  ;;  %vm111_vm12 = vcmp.eq.s32.totalorder %v94_v24, %v109_v20  ;;  %v626_v20 = vld [vmem:[#allocation7 + $0x20] sm:$0xff]  ;;  %v627_v21 = vld [vmem:[#allocation7 + $0x28] sm:$0xff] }
  0xd5   :  { %v116_v22 = vpop.permute.xlu1 %115  ;;  %v102_v23 = vpop.permute.xlu0 %101 }
  0xd6   :  { %vm103_vm6 = vcmp.eq.s32.totalorder %v1505_v3, %v102_v23  ;;  %vm104_vm8 = vcmp.eq.s32.totalorder %v94_v24, %v102_v23  ;;  %vm117_vm15 = vcmp.eq.s32.totalorder %v1505_v3, %v116_v22  ;;  %vm118_vm1 = vcmp.eq.s32.totalorder %v94_v24, %v116_v22  ;;  %v628_v23 = vld [vmem:[#allocation7 + $0x30] sm:$0xff] }
  0xd7   :  { %vm105_vm9 = vmor %vm98_vm5, %vm103_vm6  ;;  %v1192_v22 = vpack.c.bf16 %v627_v21, %v626_v20 }
  0xd8   :  { %vm106_vm10 = vmor %vm99_vm7, %vm104_vm8 }
  0xd9   :  { %vm112_vm13 = vmor %vm105_vm9, %vm110_vm11 }
  0xda   :  { %v123_v25 = vpop.permute.xlu1 %122  ;;  %vm113_vm14 = vmor %vm106_vm10, %vm111_vm12  ;;  %v130_v26 = vpop.permute.xlu0 %129 }
  0xdb   :  { %vm124_vm0 = vcmp.eq.s32.totalorder %v1505_v3, %v123_v25  ;;  %vm119_vm2 = vmor %vm112_vm13, %vm117_vm15  ;;  %vm125_vm3 = vcmp.eq.s32.totalorder %v94_v24, %v123_v25  ;;  %vm131_vm6 = vcmp.eq.s32.totalorder %v1505_v3, %v130_v26  ;;  %vm132_vm8 = vcmp.eq.s32.totalorder %v94_v24, %v130_v26  ;;  %v630_v26 = vld [vmem:[#allocation7 + $0x40] sm:$0xff] }
  0xdc   :  { %vm120_vm4 = vmor %vm113_vm14, %vm118_vm1 }
  0xdd   :  { %vm126_vm5 = vmor %vm119_vm2, %vm124_vm0 }
  0xde   :  { %vm127_vm7 = vmor %vm120_vm4, %vm125_vm3 }
  0xdf   :  { %v137_v27 = vpop.permute.xlu1 %136  ;;  %vm133_vm11 = vmor %vm126_vm5, %vm131_vm6  ;;  %v151_v29 = vpop.permute.xlu0 %150 }
  0xe0   :  { %vm138_vm9 = vcmp.eq.s32.totalorder %v1505_v3, %v137_v27  ;;  %vm139_vm10 = vcmp.eq.s32.totalorder %v94_v24, %v137_v27  ;;  %vm134_vm12 = vmor %vm127_vm7, %vm132_vm8  ;;  %vm152_vm2 = vcmp.eq.s32.totalorder %v1505_v3, %v151_v29  ;;  %vm153_vm4 = vcmp.eq.s32.totalorder %v94_v24, %v151_v29  ;;  %v631_v27 = vld [vmem:[#allocation7 + $0x48] sm:$0xff]  ;;  %v632_v29 = vld [vmem:[#allocation7 + $0x50] sm:$0xff] }
  0xe1   :  { %vm140_vm15 = vmor %vm133_vm11, %vm138_vm9 }
  0xe2   :  { %vm141_vm14 = vmor %vm134_vm12, %vm139_vm10 }
  0xe4   :  { %v144_v28 = vpop.permute.xlu1 %143  ;;  %v172_v31 = vpop.permute.xlu0 %171 }
  0xe5   :  { %vm145_vm13 = vcmp.eq.s32.totalorder %v1505_v3, %v144_v28  ;;  %vm146_vm1 = vcmp.eq.s32.totalorder %v94_v24, %v144_v28  ;;  %v1198_v28 = vpack.c.bf16 %v631_v27, %v630_v26 }
  0xe6   :  { %vm147_vm0 = vmor %vm140_vm15, %vm145_vm13  ;;  %vm173_vm13 = vcmp.eq.s32.totalorder %v1505_v3, %v172_v31 }
  0xe7   :  { %vm148_vm3 = vmor %vm141_vm14, %vm146_vm1  ;;  %vm174_vm1 = vcmp.eq.s32.totalorder %v94_v24, %v172_v31 }
  0xe8   :  { %vm154_vm6 = vmor %vm147_vm0, %vm152_vm2  ;;  %vm282_vm2 = vcmask 523264  }
  0xe9   :  { %v158_v30 = vpop.permute.xlu1 %157  ;;  %vm155_vm8 = vmor %vm148_vm3, %vm153_vm4  ;;  %vm1681_vm4 = vmmov 0  }
  0xea   :  { %vm159_vm5 = vcmp.eq.s32.totalorder %v1505_v3, %v158_v30  ;;  %vm160_vm7 = vcmp.eq.s32.totalorder %v94_v24, %v158_v30  ;;  %v633_v30 = vld [vmem:[#allocation7 + $0x58] sm:$0xff] }
  0xeb   :  { %vm161_vm9 = vmor %vm154_vm6, %vm159_vm5  ;;  %v1201_v31 = vpack.c.bf16 %v633_v30, %v632_v29 }
  0xec   :  { %vm162_vm11 = vmor %vm155_vm8, %vm160_vm7 }
  0xee   :  { %v165_v32 = vpop.permute.xlu1 %164 }
  0xef   :  { %vm166_vm10 = vcmp.eq.s32.totalorder %v1505_v3, %v165_v32  ;;  %vm167_vm12 = vcmp.eq.s32.totalorder %v94_v24, %v165_v32  ;;  %v1135_v3 = vpack.c.bf16 %v376_v37, %v375_v36  ;;  %v629_v24 = vld [vmem:[#allocation7 + $0x38] sm:$0xff]  ;;  %v634_v32 = vld [vmem:[#allocation7 + $0x60] sm:$0xff] }
  0xf0   :  { %vm168_vm15 = vmor %vm161_vm9, %vm166_vm10  ;;  %v1195_v25 = vpack.c.bf16 %v629_v24, %v628_v23 }
  0xf1   :  { %vm169_vm14 = vmor %vm162_vm11, %vm167_vm12  ;;  %1136 = vmatpush3.bf16.msra.mxu0 %v1135_v3 }
  0xf2   :  { %vm175_vm0 = vmor %vm168_vm15, %vm173_vm13  ;;  %1137 = vmatprep.subr.bf16.mxu0 %v1372_v5 }
  0xf3   :  { %vm176_vm3 = vmor %vm169_vm14, %vm174_vm1  ;;  %v800_v33 = vsel %vm175_vm0, 1.0, %v1384_v55 }
  0xf4   :  { %v801_v34 = vsel %vm176_vm3, 1.0, %v1384_v55 }
  0xf5   :  { %803 = vmatprep.mubr.msk.f32.mxu1 %vm282_vm2, %v801_v34 }
  0xf6   :  { %351 = vmatmul.mubr.f32.vlgmr.msra.gmra.mrb[0].mxu1 %v800_v33  ;;  %v635_v33 = vld [vmem:[#allocation7 + $0x68] sm:$0xff] }
  0xf7   :  { %1001 = vmatprep.mubr.msk.f32.mxu1 %vm1681_vm4, %v1384_v55  ;;  %1163 = vmatpush3.bf16.msra.mxu1 %v1162_v49  ;;  %v1204_v34 = vpack.c.bf16 %v635_v33, %v634_v32  ;;  %v550_v49 = vsub.s32 3, %v1600_v39 }
  0xf8   :  { %1164 = vmatprep.subr.bf16.mxu1 %v1372_v5 }
  0xf9   :  { %v551_v50 = vrot.slane %v1606_v41, %v550_v49 }
  0xfb   :  { %1166 = vmatpush3.bf16.msra.mxu1 %v1165_v51 }
  0xfc   :  { %1167 = vmatprep.subr.bf16.mxu1 %v1372_v5 }
  0xff   :  { %1169 = vmatpush3.bf16.msra.mxu1 %v1168_v54 }
 0x100   :  { %1170 = vmatprep.subr.bf16.mxu1 %v1372_v5 }
 0x12a   :  { %v278_v35 = vpop.f32.mrb[0].mxu0 }
 0x12b   :  { %v898_v38 = vpop.f32.mrb[1].mxu0 }
 0x12c   :  { %v523_v38 = vsub.s32 1, %v1600_v39 }
 0x12e   :  { %v524_v40 = vrot.slane %v1606_v41, %v523_v38 }
 0x1c9   :  { %v352_v43 = vpop.f32.mrb[0].mxu1 }
 0x1ca   :  { %v353_v44 = vadd.f32 %v352_v43, %v278_v35  ;;  %v354_v45 = vpop.f32.mrb[1].mxu1 }
 0x1cc   :  { %v360_v46 = vadd.f32 %v359_v42, %v353_v44 }
 0x1ce   :  { %932 = vmatmul.mubr.f32.vlgmr.msra.gmra.mrb[2].mxu0 %v360_v46 }
 0x1cf   :  { %1139 = vmatpush3.bf16.msra.mxu0 %v1549_v62  ;;  %966 = vmatprep.mubr.msk.f32.mxu0 %vm1681_vm4, %v1384_v55  ;;  %v1171_v62 = vpack.c.bf16 %v539_v61, %v538_v60  ;;  %v784_v61 = vsub.s32 4, %v1600_v39 }
 0x1d0   :  { %1140 = vmatprep.subr.bf16.mxu0 %v1372_v5 }
 0x1d1   :  { %1172 = vmatpush3.bf16.msra.mxu1 %v1171_v62  ;;  %v789_v62 = vsub.s32 5, %v1600_v39 }
 0x1d2   :  { %1173 = vmatprep.subr.bf16.mxu1 %v1372_v5 }
 0x1d3   :  { %1142 = vmatpush3.bf16.msra.mxu0 %v1554_v1  ;;  %v541_v1 = vld [vmem:[#allocation6 + $0x48] sm:$0xff] }
 0x1d4   :  { %1143 = vmatprep.subr.bf16.mxu0 %v1372_v5  ;;  %v1174_v2 = vpack.c.bf16 %v541_v1, %v540_v63  ;;  %v785_v63 = vrot.slane %v1606_v41, %v784_v61 }
 0x1d6   :  { %1175 = vmatpush3.bf16.msra.mxu1 %v1174_v2 }
 0x1d7   :  { %1145 = vmatpush3.bf16.msra.mxu0 %v1559_v7  ;;  %v1177_v7 = vpack.c.bf16 %v543_v6, %v542_v4  ;;  %1176 = vmatprep.subr.bf16.mxu1 %v1372_v5  ;;  %v790_v4 = vrot.slane %v1606_v41, %v789_v62 }
 0x1d8   :  { %1146 = vmatprep.subr.bf16.mxu0 %v1372_v5 }
 0x1da   :  { %1178 = vmatpush3.bf16.msra.mxu1 %v1177_v7 }
 0x1db   :  { %1148 = vmatpush3.bf16.msra.mxu0 %v1564_v10  ;;  %v1180_v10 = vpack.c.bf16 %v545_v9, %v544_v8  ;;  %1179 = vmatprep.subr.bf16.mxu1 %v1372_v5 }
 0x1dc   :  { %1149 = vmatprep.subr.bf16.mxu0 %v1372_v5 }
 0x1de   :  { %1181 = vmatpush3.bf16.msra.mxu1 %v1180_v10 }
 0x1df   :  { %1151 = vmatpush3.bf16.msra.mxu0 %v1568_v13  ;;  %v1183_v13 = vpack.c.bf16 %v547_v12, %v546_v11  ;;  %1182 = vmatprep.subr.bf16.mxu1 %v1372_v5 }
 0x1e0   :  { %1152 = vmatprep.subr.bf16.mxu0 %v1372_v5 }
 0x1e2   :  { %1184 = vmatpush3.bf16.msra.mxu1 %v1183_v13 }
 0x1e3   :  { %1154 = vmatpush3.bf16.msra.mxu0 %v1572_v16  ;;  %1209 = vmatprep.subr.bf16.mxu1 %v1372_v5  ;;  %v624_v16 = vld [vmem:[#allocation7 + $0x10] sm:$0xff] }
 0x1e4   :  { %1155 = vmatprep.subr.bf16.mxu0 %v1372_v5 }
 0x1e7   :  { %1157 = vmatpush3.bf16.msra.mxu0 %v1576_v19  ;;  %v1189_v19 = vpack.c.bf16 %v625_v18, %v624_v16 }
 0x1e8   :  { %1158 = vmatprep.subr.bf16.mxu0 %v1372_v5 }
 0x1eb   :  { %1160 = vmatpush3.bf16.msra.mxu0 %v1135_v3  ;;  %v528_v3 = vsub.s32 2, %v1600_v39 }
 0x1ec   :  { %1185 = vmatprep.subr.bf16.mxu0 %v1372_v5 }
 0x1ed   :  { %v529_v44 = vrot.slane %v1606_v41, %v528_v3 }
 0x2a1   :  { %v443_v56 = vpop.f32.mrb[2].mxu0 }
 0x2a2   :  { %v1629_v57 = vsub.f32 %v360_v46, %v443_v56  ;;  %v933_v58 = vpop.f32.mrb[3].mxu0 }
 0x2a4   :  { %v448_v59 = vmul.f32 %v1629_v57, %v1629_v57 }
 0x2a6   :  { %967 = vmatmul.mubr.f32.vlgmr.msra.gmra.mrb[4].mxu0 %v448_v59 }
 0x2a7   :  { %1036 = vmatprep.mubr.msk.f32.mxu0 %vm1681_vm4, %v1384_v55  ;;  %1187 = vmatpush3.bf16.msra.mxu0 %v1186_v17 }
 0x2a8   :  { %1188 = vmatprep.subr.bf16.mxu0 %v1372_v5 }
 0x2ab   :  { %1190 = vmatpush3.bf16.msra.mxu0 %v1189_v19 }
 0x2ac   :  { %1191 = vmatprep.subr.bf16.mxu0 %v1372_v5 }
 0x2af   :  { %1193 = vmatpush3.bf16.msra.mxu0 %v1192_v22 }
 0x2b0   :  { %1194 = vmatprep.subr.bf16.mxu0 %v1372_v5 }
 0x2b3   :  { %1196 = vmatpush3.bf16.msra.mxu0 %v1195_v25 }
 0x2b4   :  { %1197 = vmatprep.subr.bf16.mxu0 %v1372_v5 }
 0x2b7   :  { %1199 = vmatpush3.bf16.msra.mxu0 %v1198_v28 }
 0x2b8   :  { %1200 = vmatprep.subr.bf16.mxu0 %v1372_v5 }
 0x2bb   :  { %1202 = vmatpush3.bf16.msra.mxu0 %v1201_v31 }
 0x2bc   :  { %1203 = vmatprep.subr.bf16.mxu0 %v1372_v5 }
 0x2bf   :  { %1205 = vmatpush3.bf16.msra.mxu0 %v1204_v34 }
 0x2c0   :  { %1206 = vmatprep.subr.bf16.mxu0 %v1372_v5 }
 0x379   :  { %v515_v35 = vpop.f32.mrb[4].mxu0 }
 0x37a   :  { %v516_v36 = vadd.f32 1e-05, %v515_v35  ;;  %v968_v37 = vpop.f32.mrb[5].mxu0 }
 0x37c   :  { %1266 = vrsqrt.f32 %v516_v36 }
 0x386   :  { %v1267_v42 = vpop.eup %1266 }
 0x387   :  { %v520_v43 = vmul.f32 %v1267_v42, %v1629_v57 }
 0x389   :  { %v525_v45 = vmul.f32 %v524_v40, %v520_v43 }
 0x38b   :  { %v530_v46 = vadd.f32 %v529_v44, %v525_v45 }
 0x38d   :  { %v531_v0 = vmax.f32 %v530_v46, 0.0 }
 0x38f   :  { %1002 = vmatmul.mubr.f32.vlgmr.msra.gmra.mrb[2].mxu1 %v531_v0 }
 0x390   :  { %1211 = vmatpush3.bf16.msra.mxu1 %v1186_v17  ;;  %1071 = vmatprep.mubr.msk.f32.mxu1 %vm1681_vm4, %v1384_v55  ;;  %v636_v55 = vld [vmem:[#allocation7 + $0x70] sm:$0xff] }
 0x391   :  { %1212 = vmatprep.subr.bf16.mxu1 %v1372_v5  ;;  %v1207_v48 = vpack.c.bf16 %v637_v47, %v636_v55 }
 0x393   :  { %1208 = vmatpush3.bf16.msra.mxu0 %v1207_v48 }
 0x394   :  { %1214 = vmatpush3.bf16.msra.mxu1 %v1189_v19 }
 0x395   :  { %1215 = vmatprep.subr.bf16.mxu1 %v1372_v5 }
 0x398   :  { %1217 = vmatpush3.bf16.msra.mxu1 %v1192_v22 }
 0x399   :  { %1218 = vmatprep.subr.bf16.mxu1 %v1372_v5 }
 0x39c   :  { %1220 = vmatpush3.bf16.msra.mxu1 %v1195_v25 }
 0x39d   :  { %1221 = vmatprep.subr.bf16.mxu1 %v1372_v5 }
 0x3a0   :  { %1223 = vmatpush3.bf16.msra.mxu1 %v1198_v28 }
 0x3a1   :  { %1224 = vmatprep.subr.bf16.mxu1 %v1372_v5 }
 0x3a4   :  { %1226 = vmatpush3.bf16.msra.mxu1 %v1201_v31 }
 0x3a5   :  { %1227 = vmatprep.subr.bf16.mxu1 %v1372_v5 }
 0x3a8   :  { %1229 = vmatpush3.bf16.msra.mxu1 %v1204_v34 }
 0x3a9   :  { %1230 = vmatprep.subr.bf16.mxu1 %v1372_v5 }
 0x3ac   :  { %1232 = vmatpush3.bf16.msra.mxu1 %v1207_v48 }
 0x462   :  { %v618_v51 = vpop.f32.mrb[2].mxu1 }
 0x463   :  { %v619_v52 = vadd.f32 %v618_v51, %v551_v50  ;;  %v1003_v53 = vpop.f32.mrb[3].mxu1 }
 0x465   :  { %1037 = vmatmul.mubr.f32.vlgmr.msra.gmra.mrb[6].mxu0 %v619_v52 }
 0x538   :  { %v704_v54 = vpop.f32.mrb[6].mxu0 }
 0x539   :  { %v708_v56 = vsub.f32 %v619_v52, %v704_v54  ;;  %v1038_v57 = vpop.f32.mrb[7].mxu0 }
 0x53b   :  { %v709_v58 = vmul.f32 %v708_v56, %v708_v56 }
 0x53d   :  { %1072 = vmatmul.mubr.f32.vlgmr.msra.gmra.mrb[4].mxu1 %v709_v58 }
 0x610   :  { %v776_v59 = vpop.f32.mrb[4].mxu1 }
 0x611   :  { %v777_v5 = vadd.f32 1e-05, %v776_v59  ;;  %v1073_v60 = vpop.f32.mrb[5].mxu1 }
 0x613   :  { %1268 = vrsqrt.f32 %v777_v5 }
 0x61d   :  { %v1269_v1 = vpop.eup %1268 }
 0x61e   :  { %v781_v2 = vmul.f32 %v1269_v1, %v708_v56 }
 0x620   :  { %v786_v6 = vmul.f32 %v785_v63, %v781_v2 }
 0x622   :  { %v791_v7 = vadd.f32 %v790_v4, %v786_v6 }
 0x624   :  { %792 = vst [vmem:[%s1678_s8] sm:$0xf] %v791_v7 }
 0x625   :  { %797 = vsyncpa [#allocation3], 1 }
 0x626   :  { %798 = vsyncpa [#allocation5], 1 }
 0x627   :  { %799 = vsyncpa [#allocation8], 1 }

</bundles_post_ra>
